<compile_context>
chip_gen: v7x
topology: tpu7x:2x2x1
jax: 0.10.0
libtpu: 0.0.40
codegen_flags: <defaults>
</compile_context>

<pallas_src>
import functools
import math

import jax
import jax.numpy as jnp
import numpy as np
from jax.experimental import pallas as pl
from jax.experimental.pallas import tpu as pltpu


_TARGET_BLOCK_BYTES = 4 * 1024 * 1024  # ~4 MiB per input-half DMA block


def _round_up(a, m):
    return ((a + m - 1) // m) * m


def _sublane_pack(dtype):
    # Rows per packed sublane group: 8 for 4-byte, 16 for 2-byte, 32 for 1-byte.
    return max(8, 32 // jnp.dtype(dtype).itemsize)


def _vmem_budget():
    """(per-step working-set budget, vmem_limit_bytes), gated by chip VMEM."""
    budget, limit = 24 * 1024 * 1024, 32 * 1024 * 1024  # safe for v7x (64 MiB/TC)
    try:
        info = pltpu.get_tpu_info()
        vmem = getattr(info, "vmem_capacity_bytes", None)
        if vmem is not None and vmem >= 100 * 1024 * 1024:  # v5e / v6e: 128 MiB
            budget, limit = 56 * 1024 * 1024, 96 * 1024 * 1024
    except Exception:
        pass
    return budget, limit


# ----------------------------------------------------------------------------
# Kernels (purely elementwise; safe with ragged boundary blocks).
# ----------------------------------------------------------------------------
def _glu_elementwise_kernel(a_ref, g_ref, o_ref):
    # Halves were split by the BlockSpec DMAs; no in-kernel relayout needed.
    a = a_ref[...].astype(jnp.float32)
    g = g_ref[...].astype(jnp.float32)
    o_ref[...] = (a * jax.nn.sigmoid(g)).astype(o_ref.dtype)


def _glu_fused_lanes_kernel(x_ref, o_ref, *, c):
    # dim == last, C not a multiple of 128: split along the lane axis in-kernel.
    x = x_ref[...]
    a = x[:, :c].astype(jnp.float32)
    g = x[:, c:].astype(jnp.float32)
    o_ref[...] = (a * jax.nn.sigmoid(g)).astype(o_ref.dtype)


def _glu_fused_sublanes_kernel(x_ref, o_ref, *, c):
    # dim != last, C not sublane-aligned: split along the sublane axis in-kernel.
    x = x_ref[...]
    a = x[:, :c, :].astype(jnp.float32)
    g = x[:, c:, :].astype(jnp.float32)
    o_ref[...] = (a * jax.nn.sigmoid(g)).astype(o_ref.dtype)


# ----------------------------------------------------------------------------
# Tile-size helpers (byte-targeted: aim for ~4 MiB per input-half block).
# ----------------------------------------------------------------------------
def _pick_rows(rows, c_block, dsize, sub, budget):
    bytes_per_row = 6 * c_block * dsize  # a + g + out, double-buffered
    target_rows = _TARGET_BLOCK_BYTES // max(1, c_block * dsize)
    budget_rows = budget // max(1, bytes_per_row)
    tile_rows = min(max(sub, target_rows), max(sub, budget_rows),
                    _round_up(rows, sub))
    return max(sub, (tile_rows // sub) * sub)


def _pick_pre(pre, slice_elems, dsize, budget):
    slice_bytes = max(1, slice_elems * dsize)  # one pre-row of one half block
    target = max(1, _TARGET_BLOCK_BYTES // slice_bytes)
    cap = max(1, budget // (6 * slice_bytes))
    return max(1, min(pre, target, cap))


def _largest_fitting_divisor(c, unit, max_size):
    """Largest divisor of c that is a multiple of `unit` and <= max_size.

    Returns None if c is not a multiple of `unit` (caller falls back to the
    fused path).  Always returns at least `unit` otherwise.
    """
    if c % unit != 0:
        return None
    k = c // unit
    cap = max(1, min(k, max_size // unit))
    for d in range(cap, 0, -1):
        if k % d == 0:
            return d * unit
    return unit


# ----------------------------------------------------------------------------
# dim == last axis: flatten leading dims into rows, split in lanes.
# ----------------------------------------------------------------------------
def _glu_last_axis(x2d, c, budget, limit):
    rows, two_c = x2d.shape
    dsize = jnp.dtype(x2d.dtype).itemsize
    sub = _sublane_pack(x2d.dtype)

    cost = pl.CostEstimate(
        flops=2 * rows * c,
        transcendentals=rows * c,
        bytes_accessed=rows * (two_c + c) * dsize,
    )
    out_shape = jax.ShapeDtypeStruct((rows, c), x2d.dtype)

    if c % 128 == 0:
        # Lane-dense two-half path: the channel split is done by two BlockSpec
        # DMAs on the same array; stores are unmasked and lane-dense.
        tile_c = c
        if 6 * sub * c * dsize > budget:  # huge C: also tile the lane axis
            max_c = max(128, (budget // (6 * sub * dsize)) // 128 * 128)
            tile_c = min(c, max_c)
            while c % tile_c != 0:
                tile_c -= 128
        tile_rows = _pick_rows(rows, tile_c, dsize, sub, budget)
        n_c_blocks = c // tile_c
        grid = (pl.cdiv(rows, tile_rows), n_c_blocks)
        return pl.pallas_call(
            _glu_elementwise_kernel,
            out_shape=out_shape,
            grid=grid,
            in_specs=[
                pl.BlockSpec((tile_rows, tile_c), lambda i, j: (i, j)),
                pl.BlockSpec((tile_rows, tile_c),
                             lambda i, j, nb=n_c_blocks: (i, nb + j)),
            ],
            out_specs=pl.BlockSpec((tile_rows, tile_c), lambda i, j: (i, j)),
            compiler_params=pltpu.CompilerParams(
                dimension_semantics=("parallel", "parallel"),
                vmem_limit_bytes=limit),
            cost_estimate=cost,
        )(x2d, x2d)

    # Fallback: one (tile_rows, 2C) block, split with static lane slices.
    tile_rows = _pick_rows(rows, c, dsize, sub, budget)
    grid = (pl.cdiv(rows, tile_rows),)
    return pl.pallas_call(
        functools.partial(_glu_fused_lanes_kernel, c=c),
        out_shape=out_shape,
        grid=grid,
        in_specs=[pl.BlockSpec((tile_rows, two_c), lambda i: (i, 0))],
        out_specs=pl.BlockSpec((tile_rows, c), lambda i: (i, 0)),
        compiler_params=pltpu.CompilerParams(
            dimension_semantics=("parallel",),
            vmem_limit_bytes=limit),
        cost_estimate=cost,
    )(x2d)


# ----------------------------------------------------------------------------
# dim != last axis: keep natural lanes, view as (pre, 2C, post), split on the
# middle (sublane) axis via BlockSpec index_maps.  No HBM transposes.
# ----------------------------------------------------------------------------
def _glu_mid_axis(x3, c, budget, limit):
    pre, two_c, post = x3.shape
    dsize = jnp.dtype(x3.dtype).itemsize
    sub = _sublane_pack(x3.dtype)

    cost = pl.CostEstimate(
        flops=2 * pre * c * post,
        transcendentals=pre * c * post,
        bytes_accessed=pre * (two_c + c) * post * dsize,
    )
    out_shape = jax.ShapeDtypeStruct((pre, c, post), x3.dtype)

    # Lane (post) blocking: full post when it fits, else a multiple of 128.
    per_lane_bytes = 6 * c * dsize
    if post <= 128 or per_lane_bytes * post <= budget:
        bl = post
    else:
        bl = max(128, min((budget // per_lane_bytes) // 128 * 128,
                          (post // 128) * 128))

    # Mid (channel) blocking: a sublane-aligned divisor of C, else fused.
    bc = _largest_fitting_divisor(c, sub, max(1, budget // (6 * bl * dsize)))

    if bc is not None:
        n_mid_blocks = c // bc
        bp = _pick_pre(pre, bc * bl, dsize, budget)
        grid = (pl.cdiv(pre, bp), n_mid_blocks, pl.cdiv(post, bl))
        return pl.pallas_call(
            _glu_elementwise_kernel,
            out_shape=out_shape,
            grid=grid,
            in_specs=[
                pl.BlockSpec((bp, bc, bl), lambda i, k, j: (i, k, j)),
                pl.BlockSpec((bp, bc, bl),
                             lambda i, k, j, nb=n_mid_blocks: (i, nb + k, j)),
            ],
            out_specs=pl.BlockSpec((bp, bc, bl), lambda i, k, j: (i, k, j)),
            compiler_params=pltpu.CompilerParams(
                dimension_semantics=("parallel", "parallel", "parallel"),
                vmem_limit_bytes=limit),
            cost_estimate=cost,
        )(x3, x3)

    # Fallback: full 2C in sublanes, split with static sublane slices.
    bp = _pick_pre(pre, c * bl, dsize, budget)
    grid = (pl.cdiv(pre, bp), pl.cdiv(post, bl))
    return pl.pallas_call(
        functools.partial(_glu_fused_sublanes_kernel, c=c),
        out_shape=out_shape,
        grid=grid,
        in_specs=[pl.BlockSpec((bp, two_c, bl), lambda i, j: (i, 0, j))],
        out_specs=pl.BlockSpec((bp, c, bl), lambda i, j: (i, 0, j)),
        compiler_params=pltpu.CompilerParams(
            dimension_semantics=("parallel", "parallel"),
            vmem_limit_bytes=limit),
        cost_estimate=cost,
    )(x3)


# ----------------------------------------------------------------------------
# Public wrapper (matches torch GLU.forward semantics).
# ----------------------------------------------------------------------------
def glu(x, dim=-1):
    """out, gate = x.chunk(2, dim); return out * sigmoid(gate)."""
    dim = dim % x.ndim
    two_c = x.shape[dim]
    assert two_c % 2 == 0, "GLU split dimension must be even"
    c = two_c // 2
    budget, limit = _vmem_budget()

    if dim == x.ndim - 1:
        lead = x.shape[:-1]
        x2d = x.reshape(-1, two_c)                 # free: merges leading axes
        out2d = _glu_last_axis(x2d, c, budget, limit)
        return out2d.reshape(lead + (c,))

    pre = math.prod(x.shape[:dim]) if dim > 0 else 1
    post = math.prod(x.shape[dim + 1:])
    x3 = x.reshape(pre, two_c, post)               # free: merges contiguous axes
    out3 = _glu_mid_axis(x3, c, budget, limit)
    return out3.reshape(x.shape[:dim] + (c,) + x.shape[dim + 1:])


def _reference(x, dim=-1):
    """Pure-JAX reference matching torch GLU.forward."""
    a, g = jnp.split(x, 2, axis=dim)
    return a * jax.nn.sigmoid(g)


if __name__ == "__main__":
    key = jax.random.PRNGKey(0)
    k1, k2, k3, k4 = jax.random.split(key, 4)
    glu_jit = jax.jit(glu, static_argnames="dim")

    # Case 1: split along the last axis, C=128 -> lane-dense two-BlockSpec path.
    x1 = jax.random.normal(k1, (2, 16, 256), jnp.float32)
    o1 = jax.block_until_ready(glu_jit(x1, dim=-1))
    np.testing.assert_allclose(np.asarray(o1), np.asarray(_reference(x1, dim=-1)),
                               rtol=1e-5, atol=1e-5)

    # Case 2: GLU(dim=1) on (B, 2*C, N) -> (pre, 2C, post) mid-axis split path
    # (no transposes; natural lanes kept).
    x2 = jax.random.normal(k2, (2, 64, 16), jnp.float32)
    o2 = jax.block_until_ready(glu_jit(x2, dim=1))
    np.testing.assert_allclose(np.asarray(o2), np.asarray(_reference(x2, dim=1)),
                               rtol=1e-5, atol=1e-5)

    # Case 3: last-axis split with C not a multiple of 128 and ragged rows
    # -> fused-lanes fallback + cdiv grid (no jnp.pad).
    x3 = jax.random.normal(k3, (3, 7, 96), jnp.float32)
    o3 = jax.block_until_ready(glu_jit(x3, dim=-1))
    np.testing.assert_allclose(np.asarray(o3), np.asarray(_reference(x3, dim=-1)),
                               rtol=1e-5, atol=1e-5)

    # Case 4: bf16 last-axis split (16-row sublane packing, ragged row tail).
    x4 = jax.random.normal(k4, (4, 30, 256), jnp.bfloat16)
    o4 = jax.block_until_ready(glu_jit(x4, dim=2))
    np.testing.assert_allclose(np.asarray(o4, dtype=np.float32),
                               np.asarray(_reference(x4, dim=2), dtype=np.float32),
                               rtol=2e-2, atol=2e-2)

    print("KERNEL_OK")
</pallas_src>

<mosaic_0001>
module attributes {stable_mosaic.version = 11 : i64} {
  func.func @_glu_elementwise_kernel(%arg0: i32, %arg1: i32, %arg2: memref<32x128xf32, #tpu.memory_space<vmem>>, %arg3: memref<32x128xf32, #tpu.memory_space<vmem>>, %arg4: memref<32x128xf32, #tpu.memory_space<vmem>>) attributes {dimension_semantics = [#tpu.dimension_semantics<parallel>, #tpu.dimension_semantics<parallel>], iteration_bounds = array<i64: 1, 1>, scalar_prefetch = 0 : i64, scratch_operands = 0 : i64, tpu.core_type = #tpu.core_type<tc>, window_params = [{transform_indices = @transform_0, window_bounds = array<i64: 32, 128>}, {transform_indices = @transform_1, window_bounds = array<i64: 32, 128>}, {transform_indices = @transform_2, window_bounds = array<i64: 32, 128>}]} {
    %c0 = arith.constant 0 : index
    %c0_0 = arith.constant 0 : index
    %0 = vector.load %arg2[%c0, %c0_0] : memref<32x128xf32, #tpu.memory_space<vmem>>, vector<32x128xf32>
    %c0_1 = arith.constant 0 : index
    %c0_2 = arith.constant 0 : index
    %1 = vector.load %arg3[%c0_1, %c0_2] : memref<32x128xf32, #tpu.memory_space<vmem>>, vector<32x128xf32>
    %2 = arith.negf %1 : vector<32x128xf32>
    %3 = math.exp %2 : vector<32x128xf32>
    %cst = arith.constant 1.000000e+00 : f32
    %4 = vector.broadcast %cst : f32 to vector<32x128xf32>
    %5 = arith.addf %4, %3 : vector<32x128xf32>
    %6 = arith.divf %4, %5 : vector<32x128xf32>
    %7 = arith.mulf %0, %6 : vector<32x128xf32>
    %c0_3 = arith.constant 0 : index
    %c0_4 = arith.constant 0 : index
    %8 = vector.load %arg4[%c0_3, %c0_4] : memref<32x128xf32, #tpu.memory_space<vmem>>, vector<32x128xf32>
    tpu.vector_store %arg4[%c0_3, %c0_4], %7 {strides = array<i32>} : memref<32x128xf32, #tpu.memory_space<vmem>>, vector<32x128xf32>,
    return
  }
  func.func @transform_0(%arg0: i32, %arg1: i32) -> (i32, i32) {
    %c0_i32 = arith.constant 0 : i32
    return %arg0, %arg1 : i32, i32
  }
  func.func @transform_1(%arg0: i32, %arg1: i32) -> (i32, i32) {
    %c1_i32 = arith.constant 1 : i32
    %0 = arith.addi %c1_i32, %arg1 : i32
    %c0_i32 = arith.constant 0 : i32
    return %arg0, %0 : i32, i32
  }
  func.func @transform_2(%arg0: i32, %arg1: i32) -> (i32, i32) {
    %c0_i32 = arith.constant 0 : i32
    return %arg0, %arg1 : i32, i32
  }
}

</mosaic_0001>

<bundles_post_ra>
// kernel: glu.1
= control target key start
LH: loop header
LB: loop body
LE: loop exit
PB: predicated region body
PF: predicated region fallthrough
CT: control target
= control target key end

     0   :  { %7 = vsyncpa [#allocation3], 0  ;;  %s271_s0 = inlined_call_operand.hbm [shape: f32[32,256], index: 0, kind: input, shape index: {}, may-alias: {0,1}]   ;;  %s272_s1 = inlined_call_operand.hbm [shape: f32[32,256], index: 1, kind: input, shape index: {}, may-alias: {0,1}]   ;;  %s273_s2 = inlined_call_operand.hbm [shape: f32[32,128], index: 2, kind: output, shape index: {}]  }
   0x1   :  { %8 = vsyncpa [#allocation6], 0 }
   0x2   :  { %9 = vsyncpa [#allocation4], 0  ;;  %s204_s9 = smov [#allocation2]   ;;  %s129_s13 = scalar_lea.hbm %s271_s0, 512 }
   0x3   :  { %s15_s10 = sshll.u32 %s204_s9, 4  ;;  %p130_p0 = scmp.ne.s32.totalorder %s271_s0, %s129_s13  ;;  %s16_s10 = int_to_ptr.vmem [resolvable:$true] %s15_s10 }
   0x4   :  { %s131_s18 = scalar_lea.hbm %s271_s0, 1024  ;;  %p133_p2 = scmp.lt.u32.totalorder %s129_s13, %s271_s0 }
   0x5   :  { %p132_p1 = scmp.lt.u32.totalorder %s131_s18, %s129_s13 }
   0x7   :  { %p134_p3 = por %p133_p2, %p132_p1 }
   0x9   :  { %p135_p4 = pnand %p134_p3, %p130_p0 }
   0xb   :  { %138 = shalt.err (!%p135_p4)
}
   0xc   :  { %s139_s21 = scalar_lea.vmem %s16_s10, 512  ;;  %p144_p6 = scmp.lt.s32.totalorder %s16_s10, %s16_s10 }
   0xd   :  { %p140_p5 = scmp.ne.s32.totalorder %s16_s10, %s139_s21  ;;  %p145_p7 = scmp.lt.s32.totalorder %s139_s21, %s139_s21 }
   0xf   :  { %p146_p8 = por %p145_p7, %p144_p6 }
  0x11   :  { %p147_p9 = pnand %p146_p8, %p140_p5 }
  0x13   :  { %150 = shalt.err (!%p147_p9)
}
  0x14   :  { %s205_s22 = smov 256   ;;  %s206_s23 = smov 128  }
  0x15   :  { %s207_s24 = smov 8   ;;  %s102_s29 = scalar_lea.hbm %s272_s1, 128 }
  0x16   :  { %21 = dma.hbm_to_vmem [thread:$0]  %s271_s0, 512, %s16_s10, [#allocation3], %s205_s22, %s206_s23, %s207_s24  }
  0x17   :  { %s208_s30 = smov [#allocation5]   ;;  %s175_s6 = scalar_lea.hbm %s272_s1, 640 }
  0x18   :  { %s30_s3 = sshll.u32 %s208_s30, 4  ;;  %p152_p10 = scmp.ne.s32.totalorder %s102_s29, %s175_s6  ;;  %s31_s3 = int_to_ptr.vmem [resolvable:$true] %s30_s3 }
  0x19   :  { %s153_s9 = scalar_lea.hbm %s272_s1, 1024  ;;  %p154_p11 = scmp.lt.u32.totalorder %s102_s29, %s272_s1 }
  0x1a   :  { %p155_p12 = scmp.lt.u32.totalorder %s153_s9, %s175_s6  ;;  %p157_p0 = scmp.lt.u32.totalorder %s175_s6, %s102_s29 }
  0x1c   :  { %p156_p13 = por %p155_p12, %p154_p11 }
  0x1e   :  { %p158_p1 = por %p157_p0, %p156_p13 }
  0x20   :  { %p159_p2 = pnand %p158_p1, %p152_p10 }
  0x22   :  { %162 = shalt.err (!%p159_p2)
}
  0x23   :  { %s163_s0 = scalar_lea.vmem %s31_s3, 512  ;;  %p168_p4 = scmp.lt.s32.totalorder %s31_s3, %s31_s3 }
  0x24   :  { %p164_p3 = scmp.ne.s32.totalorder %s31_s3, %s163_s0  ;;  %p169_p5 = scmp.lt.s32.totalorder %s163_s0, %s163_s0 }
  0x26   :  { %p170_p6 = por %p169_p5, %p168_p4 }
  0x28   :  { %p171_p7 = pnand %p170_p6, %p164_p3 }
  0x2a   :  { %174 = shalt.err (!%p171_p7)
}
  0x2b   :  { %36 = dma.hbm_to_vmem [thread:$0]  %s102_s29, 512, %s31_s3, [#allocation6], %s205_s22, %s206_s23, %s207_s24  }
  0x2c   :  { %198 = dma.done.wait [#allocation3], 512  }
  0x2d   :  { %199 = vsyncadd [#allocation3], 4294966784 }
  0x2e   :  { %200 = dma.done.wait [#allocation6], 512  }
  0x2f   :  { %201 = vsyncadd [#allocation6], 4294966784  ;;  %v48_v0 = vld [vmem:[#allocation5] sm:$0xff]  ;;  %v49_v2 = vld [vmem:[#allocation5 + $0x8] sm:$0xff]  ;;  %s209_s1 = smov [#allocation7]  }
  0x30   :  { %v103_v1 = vmul.f32 -1.442695, %v48_v0  ;;  %v50_v3 = vld [vmem:[#allocation5 + $0x10] sm:$0xff]  ;;  %v104_v4 = vmul.f32 -1.442695, %v49_v2  ;;  %v51_v6 = vld [vmem:[#allocation5 + $0x18] sm:$0xff] }
  0x31   :  { %v105_v5 = vmul.f32 -1.442695, %v50_v3  ;;  %v106_v7 = vmul.f32 -1.442695, %v51_v6  ;;  %v44_v16 = vld [vmem:[#allocation2] sm:$0xff]  ;;  %v45_v17 = vld [vmem:[#allocation2 + $0x8] sm:$0xff] }
  0x32   :  { %113 = vpow2.f32 %v103_v1  ;;  %v46_v19 = vld [vmem:[#allocation2 + $0x10] sm:$0xff]  ;;  %v47_v22 = vld [vmem:[#allocation2 + $0x18] sm:$0xff]  ;;  %s89_s10 = sshll.u32 %s209_s1, 4  ;;  %s90_s10 = int_to_ptr.vmem [resolvable:$true] %s89_s10 }
  0x33   :  { %115 = vpow2.f32 %v104_v4  ;;  %s176_s13 = scalar_lea.vmem %s90_s10, 512  ;;  %p181_p9 = scmp.lt.s32.totalorder %s90_s10, %s90_s10 }
  0x34   :  { %117 = vpow2.f32 %v105_v5  ;;  %p177_p8 = scmp.ne.s32.totalorder %s90_s10, %s176_s13  ;;  %p182_p10 = scmp.lt.s32.totalorder %s176_s13, %s176_s13 }
  0x35   :  { %119 = vpow2.f32 %v106_v7 }
  0x36   :  { %p183_p11 = por %p182_p10, %p181_p9 }
  0x38   :  { %p184_p12 = pnand %p183_p11, %p177_p8 }
  0x3c   :  { %v114_v8 = vpop.eup %113 }
  0x3d   :  { %v116_v9 = vpop.eup %115  ;;  %v64_v10 = vadd.f32 1.0, %v114_v8 }
  0x3e   :  { %v118_v11 = vpop.eup %117  ;;  %v65_v12 = vadd.f32 1.0, %v116_v9 }
  0x3f   :  { %v120_v13 = vpop.eup %119  ;;  %121 = vrcp.f32 %v64_v10  ;;  %v66_v14 = vadd.f32 1.0, %v118_v11 }
  0x40   :  { %123 = vrcp.f32 %v65_v12  ;;  %v67_v15 = vadd.f32 1.0, %v120_v13 }
  0x41   :  { %125 = vrcp.f32 %v66_v14 }
  0x42   :  { %127 = vrcp.f32 %v67_v15 }
  0x49   :  { %v122_v18 = vpop.eup %121 }
  0x4a   :  { %v124_v20 = vpop.eup %123  ;;  %v76_v21 = vmul.f32 %v122_v18, %v44_v16 }
  0x4b   :  { %v126_v23 = vpop.eup %125  ;;  %v77_v24 = vmul.f32 %v124_v20, %v45_v17 }
  0x4c   :  { %v128_v25 = vpop.eup %127  ;;  %80 = vst [vmem:[#allocation7] sm:$0xff] %v76_v21  ;;  %v78_v26 = vmul.f32 %v126_v23, %v46_v19 }
  0x4d   :  { %81 = vst [vmem:[#allocation7 + $0x8] sm:$0xff] %v77_v24  ;;  %v79_v27 = vmul.f32 %v128_v25, %v47_v22 }
  0x4e   :  { %82 = vst [vmem:[#allocation7 + $0x10] sm:$0xff] %v78_v26 }
  0x4f   :  { %83 = vst [vmem:[#allocation7 + $0x18] sm:$0xff] %v79_v27 }
  0x50   :  { %187 = shalt.err (!%p184_p12)
}
  0x51   :  { %s188_s16 = scalar_lea.hbm %s273_s2, 512 }
  0x52   :  { %p189_p13 = scmp.ne.s32.totalorder %s273_s2, %s188_s16  ;;  %p192_p0 = scmp.lt.u32.totalorder %s188_s16, %s273_s2 }
  0x54   :  { %p194_p1 = pnand %p192_p0, %p189_p13 }
  0x56   :  { %197 = shalt.err (!%p194_p1)
}
  0x57   :  { %95 = dma.vmem_to_hbm [thread:$0]  %s90_s10, 512, %s273_s2, [#allocation4], %s206_s23, %s206_s23, %s207_s24  }
  0x58   :  { %202 = dma.done.wait [#allocation4], 512  }
  0x59   :  { %203 = vsyncadd [#allocation4], 4294966784 }
  0x5a   :  { %99 = vsyncpa [#allocation3], 1 }
  0x5b   :  { %100 = vsyncpa [#allocation6], 1 }
  0x5c   :  { %101 = vsyncpa [#allocation4], 1 }

</bundles_post_ra>
